<compile_context>
chip_gen: v7x
topology: tpu7x:2x2x1
jax: 0.10.0
libtpu: 0.0.40
codegen_flags: <defaults>
</compile_context>

<pallas_src>
from typing import NamedTuple

import jax
import jax.numpy as jnp
from jax.experimental import pallas as pl
from jax.experimental.pallas import tpu as pltpu

_SUBLANE = 8
_LANE = 128


def _round_up(x, m):
    return ((x + m - 1) // m) * m


def mlp_kernel(x_ref, w0_ref, b0_ref, w1_ref, b1_ref, w2_ref, b2_ref, out_ref):
    # Cast x to the compute (weight) dtype in-register; MXU accumulates in f32
    # via preferred_element_type, bias-add / ReLU stay in f32.
    x = x_ref[...].astype(w0_ref.dtype)
    h = jnp.dot(x, w0_ref[...], preferred_element_type=jnp.float32)
    h = jnp.maximum(h + b0_ref[...], 0.0)
    h = h.astype(w1_ref.dtype)
    h = jnp.dot(h, w1_ref[...], preferred_element_type=jnp.float32)
    h = jnp.maximum(h + b1_ref[...], 0.0)
    h = h.astype(w2_ref.dtype)
    y = jnp.dot(h, w2_ref[...], preferred_element_type=jnp.float32)
    out_ref[...] = (y + b2_ref[...]).astype(out_ref.dtype)


class PreparedParams(NamedTuple):
    w0: jax.Array  # (F, Hp)  compute dtype
    b0: jax.Array  # (1, Hp)  f32
    w1: jax.Array  # (Hp, Hp) compute dtype
    b1: jax.Array  # (1, Hp)  f32
    w2: jax.Array  # (Hp, O)  compute dtype
    b2: jax.Array  # (1, O)   f32
    n_feature: int
    n_hidden: int
    n_output: int


def prepare_params(params, compute_dtype=None):
    """One-time weight/bias preparation (dtype cast + hidden-dim zero padding).

    Only the hidden dim is padded (zero rows/cols, zero bias, ReLU(0)=0 -> exact
    no-op); the input-feature and output dims keep their true sizes so x and the
    output need no per-call padding / slicing passes.
    """
    w0, b0, w1, b1, w2, b2 = params
    F, H = w0.shape
    O = w2.shape[1]
    dt = jnp.dtype(compute_dtype) if compute_dtype is not None else jnp.dtype(w0.dtype)

    # 256-aligned hidden dim feeds full 256x256 MXU passes on v6e/v7x for real
    # hidden sizes on the bf16 path; 128 otherwise (no effect on v5e's 128x128).
    lane_mult = 256 if (dt == jnp.bfloat16 and H > _LANE) else _LANE
    Hp = _round_up(H, lane_mult)

    w0p = jnp.zeros((F, Hp), dt).at[:, :H].set(w0.astype(dt))
    b0p = jnp.zeros((1, Hp), jnp.float32).at[:, :H].set(
        b0.reshape(1, -1).astype(jnp.float32))
    w1p = jnp.zeros((Hp, Hp), dt).at[:H, :H].set(w1.astype(dt))
    b1p = jnp.zeros((1, Hp), jnp.float32).at[:, :H].set(
        b1.reshape(1, -1).astype(jnp.float32))
    w2p = jnp.zeros((Hp, O), dt).at[:H, :].set(w2.astype(dt))
    b2p = b2.reshape(1, -1).astype(jnp.float32)
    return PreparedParams(w0p, b0p, w1p, b1p, w2p, b2p, F, H, O)


def _vmem_budgets():
    """(tile_budget, vmem_limit_cap, default_block_b) for this TPU generation."""
    try:
        cap = pltpu.get_tpu_info().vmem_capacity_bytes
    except Exception:
        cap = 64 << 20
    if cap >= (100 << 20):               # v5e / v6e: 128 MiB physical VMEM
        return 48 << 20, 96 << 20, 2048
    return 24 << 20, 56 << 20, 1024      # v7x: 64 MiB physical VMEM


def mlp_forward(x, params, *, block_b=None, compute_dtype=None):
    """Fused MLP forward.  x: (B, n_feature); params raw tuple or PreparedParams."""
    if not isinstance(params, PreparedParams):
        params = prepare_params(params, compute_dtype)
    w0p, b0p, w1p, b1p, w2p, b2p, F, H, O = params
    B, Fx = x.shape
    assert Fx == F, f"feature mismatch: {Fx} vs {F}"
    Hp = w0p.shape[1]

    compute_itemsize = jnp.dtype(w0p.dtype).itemsize
    x_itemsize = jnp.dtype(x.dtype).itemsize
    out_dtype = x.dtype
    out_itemsize = jnp.dtype(out_dtype).itemsize

    tile_budget, vmem_cap, default_tb = _vmem_budgets()
    if block_b is None:
        block_b = default_tb

    # Batch tile rounded to the packed sublane count of the compute dtype
    # (8 rows for f32, 16 for bf16, 32 for 1-byte types).
    sub = max(_SUBLANE, 32 // compute_itemsize)

    # Resident weight/bias VMEM (single-buffered on the Buffered(1) path).
    weight_vmem = ((w0p.size + w1p.size + w2p.size) * compute_itemsize
                   + (b0p.size + b1p.size + b2p.size) * 4)

    def stream_bytes(tb):
        # double-buffered x / out tiles + two live f32 (tb, Hp) hidden tiles
        return 2 * tb * (F * x_itemsize + O * out_itemsize) + 2 * tb * Hp * 4

    TB = _round_up(block_b, sub)
    while TB > sub and stream_bytes(TB) + weight_vmem > tile_budget:
        TB //= 2
    TB = max(_round_up(TB, sub), sub)
    if TB >= B:
        TB = B  # one block covers the whole batch (full-dim block is always legal)
    grid = (pl.cdiv(B, TB),)

    vmem_need = stream_bytes(TB) + weight_vmem
    vmem_limit = min(max(int(1.25 * vmem_need) + (4 << 20), 32 << 20), vmem_cap)

    cost = pl.CostEstimate(
        flops=2 * B * (F * H + H * H + H * O),
        transcendentals=0,
        bytes_accessed=B * F * x_itemsize + weight_vmem + B * O * out_itemsize,
    )

    def build(single_buffer_weights):
        def wspec(shape):
            if single_buffer_weights:
                return pl.BlockSpec(shape, lambda i: (0, 0),
                                    pipeline_mode=pl.Buffered(buffer_count=1))
            return pl.BlockSpec(shape, lambda i: (0, 0))

        return pl.pallas_call(
            mlp_kernel,
            out_shape=jax.ShapeDtypeStruct((B, O), out_dtype),
            grid=grid,
            in_specs=[
                pl.BlockSpec((TB, F), lambda i: (i, 0)),   # x: streamed, unpadded
                wspec((F, Hp)), wspec((1, Hp)),            # W0 / b0: VMEM-resident
                wspec((Hp, Hp)), wspec((1, Hp)),           # W1 / b1
                wspec((Hp, O)), wspec((1, O)),             # W2 / b2
            ],
            out_specs=pl.BlockSpec((TB, O), lambda i: (i, 0)),
            compiler_params=pltpu.CompilerParams(
                dimension_semantics=("parallel",),
                vmem_limit_bytes=vmem_limit,
            ),
            cost_estimate=cost,
        )

    args = (x, w0p, b0p, w1p, b1p, w2p, b2p)
    try:
        return build(True)(*args)
    except Exception:
        # Fallback: default double-buffered weights (correct, just more VMEM).
        return build(False)(*args)


def init_params(key, n_feature, n_hidden, n_output):
    # Deterministic init mimicking torch.nn.Linear default (U(-1/sqrt(fan_in), +)).
    ks = jax.random.split(key, 6)

    def lin(kw, kb, fan_in, fan_out):
        bound = 1.0 / (fan_in ** 0.5)
        # weight stored as (in, out) so the kernel computes x @ W (== torch x @ W.T)
        w = jax.random.uniform(kw, (fan_in, fan_out), jnp.float32, -bound, bound)
        b = jax.random.uniform(kb, (fan_out,), jnp.float32, -bound, bound)
        return w, b

    w0, b0 = lin(ks[0], ks[1], n_feature, n_hidden)
    w1, b1 = lin(ks[2], ks[3], n_hidden, n_hidden)
    w2, b2 = lin(ks[4], ks[5], n_hidden, n_output)
    return (w0, b0, w1, b1, w2, b2)


if __name__ == "__main__":
    key = jax.random.PRNGKey(0)
    kx, kp = jax.random.split(key)

    batch, n_feature, n_hidden, n_output = 8, 16, 32, 4
    x = jax.random.normal(kx, (batch, n_feature), jnp.float32)
    params = init_params(kp, n_feature, n_hidden, n_output)

    # Pure-JAX reference.
    w0, b0, w1, b1, w2, b2 = params
    ref = jnp.maximum(x @ w0 + b0, 0.0)
    ref = jnp.maximum(ref @ w1 + b1, 0.0)
    ref = ref @ w2 + b2

    # f32 path: strict check (one-time param prep, then the fused kernel).
    prep_f32 = prepare_params(params)
    out = mlp_forward(x, prep_f32)
    jax.block_until_ready(out)
    assert out.shape == (batch, n_output), f"bad shape {out.shape}"
    assert out.dtype == x.dtype, f"bad dtype {out.dtype}"
    assert jnp.allclose(out, ref, atol=1e-5, rtol=1e-5), "f32 mismatch vs reference"

    # bf16 MXU path (perf path on v6e/v7x): f32 accumulation, loose tolerance.
    prep_bf16 = prepare_params(params, compute_dtype=jnp.bfloat16)
    out_bf16 = mlp_forward(x, prep_bf16)
    jax.block_until_ready(out_bf16)
    assert out_bf16.shape == (batch, n_output)
    assert jnp.allclose(out_bf16, ref, atol=1e-1, rtol=1e-1), "bf16 mismatch vs reference"

    print("KERNEL_OK")
</pallas_src>

<mosaic_0001>
module attributes {stable_mosaic.version = 11 : i64} {
  func.func @mlp_kernel(%arg0: i32, %arg1: memref<8x16xf32, #tpu.memory_space<vmem>>, %arg2: memref<16x128xf32, #tpu.memory_space<vmem>>, %arg3: memref<1x128xf32, #tpu.memory_space<vmem>>, %arg4: memref<128x128xf32, #tpu.memory_space<vmem>>, %arg5: memref<1x128xf32, #tpu.memory_space<vmem>>, %arg6: memref<128x4xf32, #tpu.memory_space<vmem>>, %arg7: memref<1x4xf32, #tpu.memory_space<vmem>>, %arg8: memref<8x4xf32, #tpu.memory_space<vmem>>) attributes {dimension_semantics = [#tpu.dimension_semantics<parallel>], iteration_bounds = array<i64: 1>, scalar_prefetch = 0 : i64, scratch_operands = 0 : i64, tpu.core_type = #tpu.core_type<tc>, window_params = [{transform_indices = @transform_0, window_bounds = array<i64: 8, 16>}, {pipeline_mode = #tpu.pipeline_mode<synchronous>, transform_indices = @transform_1, window_bounds = array<i64: 16, 128>}, {pipeline_mode = #tpu.pipeline_mode<synchronous>, transform_indices = @transform_2, window_bounds = array<i64: 1, 128>}, {pipeline_mode = #tpu.pipeline_mode<synchronous>, transform_indices = @transform_3, window_bounds = array<i64: 128, 128>}, {pipeline_mode = #tpu.pipeline_mode<synchronous>, transform_indices = @transform_4, window_bounds = array<i64: 1, 128>}, {pipeline_mode = #tpu.pipeline_mode<synchronous>, transform_indices = @transform_5, window_bounds = array<i64: 128, 4>}, {pipeline_mode = #tpu.pipeline_mode<synchronous>, transform_indices = @transform_6, window_bounds = array<i64: 1, 4>}, {transform_indices = @transform_7, window_bounds = array<i64: 8, 4>}]} {
    %c0 = arith.constant 0 : index
    %c0_0 = arith.constant 0 : index
    %0 = vector.load %arg1[%c0, %c0_0] : memref<8x16xf32, #tpu.memory_space<vmem>>, vector<8x16xf32>
    %c0_1 = arith.constant 0 : index
    %c0_2 = arith.constant 0 : index
    %1 = vector.load %arg2[%c0_1, %c0_2] : memref<16x128xf32, #tpu.memory_space<vmem>>, vector<16x128xf32>
    %cst = arith.constant dense<0.000000e+00> : vector<8x128xf32>
    %2 = tpu.matmul %0, %1, %cst {dimension_numbers = #tpu.dot_dimension_numbers<[1], [0], [0], [1], [0, 0, 1, 1], [], []>} : vector<8x16xf32>, vector<16x128xf32>, vector<8x128xf32> -> vector<8x128xf32>
    %c0_3 = arith.constant 0 : index
    %c0_4 = arith.constant 0 : index
    %3 = vector.load %arg3[%c0_3, %c0_4] : memref<1x128xf32, #tpu.memory_space<vmem>>, vector<1x128xf32>
    %4 = vector.broadcast %3 : vector<1x128xf32> to vector<8x128xf32>
    %5 = arith.addf %2, %4 : vector<8x128xf32>
    %cst_5 = arith.constant 0.000000e+00 : f32
    %6 = vector.broadcast %cst_5 : f32 to vector<8x128xf32>
    %7 = arith.maximumf %5, %6 : vector<8x128xf32>
    %c0_6 = arith.constant 0 : index
    %c0_7 = arith.constant 0 : index
    %8 = vector.load %arg4[%c0_6, %c0_7] : memref<128x128xf32, #tpu.memory_space<vmem>>, vector<128x128xf32>
    %cst_8 = arith.constant dense<0.000000e+00> : vector<8x128xf32>
    %9 = tpu.matmul %7, %8, %cst_8 {dimension_numbers = #tpu.dot_dimension_numbers<[1], [0], [0], [1], [0, 0, 1, 1], [], []>} : vector<8x128xf32>, vector<128x128xf32>, vector<8x128xf32> -> vector<8x128xf32>
    %c0_9 = arith.constant 0 : index
    %c0_10 = arith.constant 0 : index
    %10 = vector.load %arg5[%c0_9, %c0_10] : memref<1x128xf32, #tpu.memory_space<vmem>>, vector<1x128xf32>
    %11 = vector.broadcast %10 : vector<1x128xf32> to vector<8x128xf32>
    %12 = arith.addf %9, %11 : vector<8x128xf32>
    %cst_11 = arith.constant 0.000000e+00 : f32
    %13 = vector.broadcast %cst_11 : f32 to vector<8x128xf32>
    %14 = arith.maximumf %12, %13 : vector<8x128xf32>
    %c0_12 = arith.constant 0 : index
    %c0_13 = arith.constant 0 : index
    %15 = vector.load %arg6[%c0_12, %c0_13] : memref<128x4xf32, #tpu.memory_space<vmem>>, vector<128x4xf32>
    %cst_14 = arith.constant dense<0.000000e+00> : vector<8x4xf32>
    %16 = tpu.matmul %14, %15, %cst_14 {dimension_numbers = #tpu.dot_dimension_numbers<[1], [0], [0], [1], [0, 0, 1, 1], [], []>} : vector<8x128xf32>, vector<128x4xf32>, vector<8x4xf32> -> vector<8x4xf32>
    %c0_15 = arith.constant 0 : index
    %c0_16 = arith.constant 0 : index
    %17 = vector.load %arg7[%c0_15, %c0_16] : memref<1x4xf32, #tpu.memory_space<vmem>>, vector<1x4xf32>
    %18 = vector.broadcast %17 : vector<1x4xf32> to vector<8x4xf32>
    %19 = arith.addf %16, %18 : vector<8x4xf32>
    %c0_17 = arith.constant 0 : index
    %c0_18 = arith.constant 0 : index
    %20 = vector.load %arg8[%c0_17, %c0_18] : memref<8x4xf32, #tpu.memory_space<vmem>>, vector<8x4xf32>
    tpu.vector_store %arg8[%c0_17, %c0_18], %19 {strides = array<i32>} : memref<8x4xf32, #tpu.memory_space<vmem>>, vector<8x4xf32>,
    return
  }
  func.func @transform_0(%arg0: i32) -> (i32, i32) {
    %c0_i32 = arith.constant 0 : i32
    %c0_i32_0 = arith.constant 0 : i32
    return %arg0, %c0_i32 : i32, i32
  }
  func.func @transform_1(%arg0: i32) -> (i32, i32) {
    %c0_i32 = arith.constant 0 : i32
    %c0_i32_0 = arith.constant 0 : i32
    %c0_i32_1 = arith.constant 0 : i32
    return %c0_i32, %c0_i32_0 : i32, i32
  }
  func.func @transform_2(%arg0: i32) -> (i32, i32) {
    %c0_i32 = arith.constant 0 : i32
    %c0_i32_0 = arith.constant 0 : i32
    %c0_i32_1 = arith.constant 0 : i32
    return %c0_i32, %c0_i32_0 : i32, i32
  }
  func.func @transform_3(%arg0: i32) -> (i32, i32) {
    %c0_i32 = arith.constant 0 : i32
    %c0_i32_0 = arith.constant 0 : i32
    %c0_i32_1 = arith.constant 0 : i32
    return %c0_i32, %c0_i32_0 : i32, i32
  }
  func.func @transform_4(%arg0: i32) -> (i32, i32) {
    %c0_i32 = arith.constant 0 : i32
    %c0_i32_0 = arith.constant 0 : i32
    %c0_i32_1 = arith.constant 0 : i32
    return %c0_i32, %c0_i32_0 : i32, i32
  }
  func.func @transform_5(%arg0: i32) -> (i32, i32) {
    %c0_i32 = arith.constant 0 : i32
    %c0_i32_0 = arith.constant 0 : i32
    %c0_i32_1 = arith.constant 0 : i32
    return %c0_i32, %c0_i32_0 : i32, i32
  }
  func.func @transform_6(%arg0: i32) -> (i32, i32) {
    %c0_i32 = arith.constant 0 : i32
    %c0_i32_0 = arith.constant 0 : i32
    %c0_i32_1 = arith.constant 0 : i32
    return %c0_i32, %c0_i32_0 : i32, i32
  }
  func.func @transform_7(%arg0: i32) -> (i32, i32) {
    %c0_i32 = arith.constant 0 : i32
    %c0_i32_0 = arith.constant 0 : i32
    return %arg0, %c0_i32 : i32, i32
  }
}

module attributes {stable_mosaic.version = 11 : i64} {
  func.func @mlp_kernel(%arg0: i32, %arg1: memref<8x16xf32, #tpu.memory_space<vmem>>, %arg2: memref<16x128xf32, #tpu.memory_space<vmem>>, %arg3: memref<1x128xf32, #tpu.memory_space<vmem>>, %arg4: memref<128x128xf32, #tpu.memory_space<vmem>>, %arg5: memref<1x128xf32, #tpu.memory_space<vmem>>, %arg6: memref<128x4xf32, #tpu.memory_space<vmem>>, %arg7: memref<1x4xf32, #tpu.memory_space<vmem>>, %arg8: memref<8x4xf32, #tpu.memory_space<vmem>>) attributes {dimension_semantics = [#tpu.dimension_semantics<parallel>], iteration_bounds = array<i64: 1>, scalar_prefetch = 0 : i64, scratch_operands = 0 : i64, tpu.core_type = #tpu.core_type<tc>, window_params = [{transform_indices = @transform_0, window_bounds = array<i64: 8, 16>}, {pipeline_mode = #tpu.pipeline_mode<synchronous>, transform_indices = @transform_1, window_bounds = array<i64: 16, 128>}, {pipeline_mode = #tpu.pipeline_mode<synchronous>, transform_indices = @transform_2, window_bounds = array<i64: 1, 128>}, {pipeline_mode = #tpu.pipeline_mode<synchronous>, transform_indices = @transform_3, window_bounds = array<i64: 128, 128>}, {pipeline_mode = #tpu.pipeline_mode<synchronous>, transform_indices = @transform_4, window_bounds = array<i64: 1, 128>}, {pipeline_mode = #tpu.pipeline_mode<synchronous>, transform_indices = @transform_5, window_bounds = array<i64: 128, 4>}, {pipeline_mode = #tpu.pipeline_mode<synchronous>, transform_indices = @transform_6, window_bounds = array<i64: 1, 4>}, {transform_indices = @transform_7, window_bounds = array<i64: 8, 4>}]} {
    %c0 = arith.constant 0 : index
    %c0_0 = arith.constant 0 : index
    %0 = vector.load %arg1[%c0, %c0_0] : memref<8x16xf32, #tpu.memory_space<vmem>>, vector<8x16xf32>
    %c0_1 = arith.constant 0 : index
    %c0_2 = arith.constant 0 : index
    %1 = vector.load %arg2[%c0_1, %c0_2] : memref<16x128xf32, #tpu.memory_space<vmem>>, vector<16x128xf32>
    %cst = arith.constant dense<0.000000e+00> : vector<8x128xf32>
    %2 = tpu.matmul %0, %1, %cst {dimension_numbers = #tpu.dot_dimension_numbers<[1], [0], [0], [1], [0, 0, 1, 1], [], []>} : vector<8x16xf32>, vector<16x128xf32>, vector<8x128xf32> -> vector<8x128xf32>
    %c0_3 = arith.constant 0 : index
    %c0_4 = arith.constant 0 : index
    %3 = vector.load %arg3[%c0_3, %c0_4] : memref<1x128xf32, #tpu.memory_space<vmem>>, vector<1x128xf32>
    %4 = vector.broadcast %3 : vector<1x128xf32> to vector<8x128xf32>
    %5 = arith.addf %2, %4 : vector<8x128xf32>
    %cst_5 = arith.constant 0.000000e+00 : f32
    %6 = vector.broadcast %cst_5 : f32 to vector<8x128xf32>
    %7 = arith.maximumf %5, %6 : vector<8x128xf32>
    %c0_6 = arith.constant 0 : index
    %c0_7 = arith.constant 0 : index
    %8 = vector.load %arg4[%c0_6, %c0_7] : memref<128x128xf32, #tpu.memory_space<vmem>>, vector<128x128xf32>
    %cst_8 = arith.constant dense<0.000000e+00> : vector<8x128xf32>
    %9 = tpu.matmul %7, %8, %cst_8 {dimension_numbers = #tpu.dot_dimension_numbers<[1], [0], [0], [1], [0, 0, 1, 1], [], []>} : vector<8x128xf32>, vector<128x128xf32>, vector<8x128xf32> -> vector<8x128xf32>
    %c0_9 = arith.constant 0 : index
    %c0_10 = arith.constant 0 : index
    %10 = vector.load %arg5[%c0_9, %c0_10] : memref<1x128xf32, #tpu.memory_space<vmem>>, vector<1x128xf32>
    %11 = vector.broadcast %10 : vector<1x128xf32> to vector<8x128xf32>
    %12 = arith.addf %9, %11 : vector<8x128xf32>
    %cst_11 = arith.constant 0.000000e+00 : f32
    %13 = vector.broadcast %cst_11 : f32 to vector<8x128xf32>
    %14 = arith.maximumf %12, %13 : vector<8x128xf32>
    %c0_12 = arith.constant 0 : index
    %c0_13 = arith.constant 0 : index
    %15 = vector.load %arg6[%c0_12, %c0_13] : memref<128x4xf32, #tpu.memory_space<vmem>>, vector<128x4xf32>
    %cst_14 = arith.constant dense<0.000000e+00> : vector<8x4xf32>
    %16 = tpu.matmul %14, %15, %cst_14 {dimension_numbers = #tpu.dot_dimension_numbers<[1], [0], [0], [1], [0, 0, 1, 1], [], []>} : vector<8x128xf32>, vector<128x4xf32>, vector<8x4xf32> -> vector<8x4xf32>
    %c0_15 = arith.constant 0 : index
    %c0_16 = arith.constant 0 : index
    %17 = vector.load %arg7[%c0_15, %c0_16] : memref<1x4xf32, #tpu.memory_space<vmem>>, vector<1x4xf32>
    %18 = vector.broadcast %17 : vector<1x4xf32> to vector<8x4xf32>
    %19 = arith.addf %16, %18 : vector<8x4xf32>
    %c0_17 = arith.constant 0 : index
    %c0_18 = arith.constant 0 : index
    %20 = vector.load %arg8[%c0_17, %c0_18] : memref<8x4xf32, #tpu.memory_space<vmem>>, vector<8x4xf32>
    tpu.vector_store %arg8[%c0_17, %c0_18], %19 {strides = array<i32>} : memref<8x4xf32, #tpu.memory_space<vmem>>, vector<8x4xf32>,
    return
  }
  func.func @transform_0(%arg0: i32) -> (i32, i32) {
    %c0_i32 = arith.constant 0 : i32
    %c0_i32_0 = arith.constant 0 : i32
    return %arg0, %c0_i32 : i32, i32
  }
  func.func @transform_1(%arg0: i32) -> (i32, i32) {
    %c0_i32 = arith.constant 0 : i32
    %c0_i32_0 = arith.constant 0 : i32
    %c0_i32_1 = arith.constant 0 : i32
    return %c0_i32, %c0_i32_0 : i32, i32
  }
  func.func @transform_2(%arg0: i32) -> (i32, i32) {
    %c0_i32 = arith.constant 0 : i32
    %c0_i32_0 = arith.constant 0 : i32
    %c0_i32_1 = arith.constant 0 : i32
    return %c0_i32, %c0_i32_0 : i32, i32
  }
  func.func @transform_3(%arg0: i32) -> (i32, i32) {
    %c0_i32 = arith.constant 0 : i32
    %c0_i32_0 = arith.constant 0 : i32
    %c0_i32_1 = arith.constant 0 : i32
    return %c0_i32, %c0_i32_0 : i32, i32
  }
  func.func @transform_4(%arg0: i32) -> (i32, i32) {
    %c0_i32 = arith.constant 0 : i32
    %c0_i32_0 = arith.constant 0 : i32
    %c0_i32_1 = arith.constant 0 : i32
    return %c0_i32, %c0_i32_0 : i32, i32
  }
  func.func @transform_5(%arg0: i32) -> (i32, i32) {
    %c0_i32 = arith.constant 0 : i32
    %c0_i32_0 = arith.constant 0 : i32
    %c0_i32_1 = arith.constant 0 : i32
    return %c0_i32, %c0_i32_0 : i32, i32
  }
  func.func @transform_6(%arg0: i32) -> (i32, i32) {
    %c0_i32 = arith.constant 0 : i32
    %c0_i32_0 = arith.constant 0 : i32
    %c0_i32_1 = arith.constant 0 : i32
    return %c0_i32, %c0_i32_0 : i32, i32
  }
  func.func @transform_7(%arg0: i32) -> (i32, i32) {
    %c0_i32 = arith.constant 0 : i32
    %c0_i32_0 = arith.constant 0 : i32
    return %arg0, %c0_i32 : i32, i32
  }
}

</mosaic_0001>

<bundles_post_ra>
// kernel: tpu_custom_call.1
= control target key start
LH: loop header
LB: loop body
LE: loop exit
PB: predicated region body
PF: predicated region fallthrough
CT: control target
= control target key end

     0   :  { %12 = vsyncpa [#allocation3], 0  ;;  %s518_s24 = smov [#allocation2]   ;;  %s707_s0 = inlined_call_operand.vmem [shape: f32[8,16], index: 0, kind: input, shape index: {}]   ;;  %s708_s1 = inlined_call_operand.hbm [shape: f32[16,128], index: 1, kind: input, shape index: {}]   ;;  %s709_s2 = inlined_call_operand.vmem [shape: f32[1,128], index: 2, kind: input, shape index: {}]   ;;  %s710_s3 = inlined_call_operand.vmem [shape: f32[128,128], index: 3, kind: input, shape index: {}]   ;;  %s711_s4 = inlined_call_operand.vmem [shape: f32[1,128], index: 4, kind: input, shape index: {}]   ;;  %s712_s5 = inlined_call_operand.vmem [shape: f32[128,4], index: 5, kind: input, shape index: {}]   ;;  %s713_s6 = inlined_call_operand.vmem [shape: f32[1,4], index: 6, kind: input, shape index: {}]   ;;  %s714_s7 = inlined_call_operand.vmem [shape: f32[8,4], index: 7, kind: output, shape index: {}]  }
   0x1   :  { %s20_s25 = sshll.u32 %s518_s24, 4  ;;  %s494_s28 = scalar_lea.hbm %s708_s1, 256  ;;  %s21_s25 = int_to_ptr.vmem [resolvable:$true] %s20_s25 }
   0x2   :  { %p495_p0 = scmp.ne.s32.totalorder %s708_s1, %s494_s28  ;;  %p498_p1 = scmp.lt.u32.totalorder %s494_s28, %s708_s1 }
   0x4   :  { %p500_p2 = pnand %p498_p1, %p495_p0 }
   0x6   :  { %503 = shalt.err (!%p500_p2)
}
   0x7   :  { %s504_s10 = scalar_lea.vmem %s21_s25, 256  ;;  %p509_p4 = scmp.lt.s32.totalorder %s21_s25, %s21_s25 }
   0x8   :  { %p505_p3 = scmp.ne.s32.totalorder %s21_s25, %s504_s10  ;;  %p510_p5 = scmp.lt.s32.totalorder %s504_s10, %s504_s10 }
   0xa   :  { %p511_p6 = por %p510_p5, %p509_p4 }
   0xc   :  { %p512_p7 = pnand %p511_p6, %p505_p3 }
   0xe   :  { %515 = shalt.err (!%p512_p7)
}
   0xf   :  { %s519_s11 = smov 128   ;;  %s520_s12 = smov 8  }
  0x10   :  { %26 = dma.hbm_to_vmem [thread:$0]  %s708_s1, 256, %s21_s25, [#allocation3], %s519_s11, %s519_s11, %s520_s12  }
  0x11   :  { %516 = dma.done.wait [#allocation3], 256  }
  0x12   :  { %517 = vsyncadd [#allocation3], 4294967040  ;;  %v521_v0 = vmov 0.0|0.0   ;;  %vm522_vm0 = vmmov 0   ;;  %v523_v1 = vmov 0.0   ;;  %v41_v2 = vld [vmem:[#allocation2] sm:$0xff] }
  0x13   :  { %437 = vmatprep.subr.bf16.mxu0 %v521_v0  ;;  %364 = vmatprep.mubr.msk.f32.mxu0 %vm522_vm0, %v523_v1  ;;  %v42_v3 = vld [vmem:[#allocation2 + $0x8] sm:$0xff]  ;;  %v125_v5 = vld [vmem:[%s710_s3] sm:$0xff]  ;;  %v127_v7 = vld [vmem:[%s710_s3 + $0x10] sm:$0xff]  ;;  %vm50_vm1 = vcmask 130048   ;;  %vm312_vm2 = vcmask 31744  }
  0x14   :  { %440 = vmatprep.subr.bf16.mxu1 %v521_v0  ;;  %399 = vmatprep.mubr.msk.f32.mxu1 %vm522_vm0, %v523_v1  ;;  %v438_v4 = vpack.c.bf16 %v42_v3, %v41_v2  ;;  %v126_v6 = vld [vmem:[%s710_s3 + $0x8] sm:$0xff]  ;;  %v128_v9 = vld [vmem:[%s710_s3 + $0x18] sm:$0xff]  ;;  %v40_v10 = vld [vmem:[%s707_s0] sm:$0xff] }
  0x15   :  { %v441_v8 = vpack.c.bf16 %v126_v6, %v125_v5  ;;  %v444_v11 = vpack.c.bf16 %v128_v9, %v127_v7  ;;  %v129_v12 = vld [vmem:[%s710_s3 + $0x20] sm:$0xff]  ;;  %v130_v13 = vld [vmem:[%s710_s3 + $0x28] sm:$0xff]  ;;  %v131_v15 = vld [vmem:[%s710_s3 + $0x30] sm:$0xff] }
  0x16   :  { %439 = vmatpush3.bf16.msra.mxu0 %v438_v4  ;;  %v447_v14 = vpack.c.bf16 %v130_v13, %v129_v12  ;;  %v132_v16 = vld [vmem:[%s710_s3 + $0x38] sm:$0xff]  ;;  %v133_v18 = vld [vmem:[%s710_s3 + $0x40] sm:$0xff]  ;;  %v134_v19 = vld [vmem:[%s710_s3 + $0x48] sm:$0xff] }
  0x17   :  { %442 = vmatpush3.bf16.msra.mxu1 %v441_v8  ;;  %464 = vmatprep.subr.bf16.mxu0 %v521_v0  ;;  %v450_v17 = vpack.c.bf16 %v132_v16, %v131_v15  ;;  %v453_v20 = vpack.c.bf16 %v134_v19, %v133_v18  ;;  %v135_v21 = vld [vmem:[%s710_s3 + $0x50] sm:$0xff]  ;;  %v136_v22 = vld [vmem:[%s710_s3 + $0x58] sm:$0xff]  ;;  %v137_v24 = vld [vmem:[%s710_s3 + $0x60] sm:$0xff] }
  0x18   :  { %443 = vmatprep.subr.bf16.mxu1 %v521_v0  ;;  %v456_v23 = vpack.c.bf16 %v136_v22, %v135_v21  ;;  %v138_v25 = vld [vmem:[%s710_s3 + $0x68] sm:$0xff]  ;;  %v139_v27 = vld [vmem:[%s710_s3 + $0x70] sm:$0xff]  ;;  %v140_v28 = vld [vmem:[%s710_s3 + $0x78] sm:$0xff] }
  0x19   :  { %365 = vmatmul.mubr.msk.f32.vlgmr.msra.gmra.mrb[0].mxu0 %vm50_vm1, %v40_v10  ;;  %v459_v26 = vpack.c.bf16 %v138_v25, %v137_v24  ;;  %v462_v29 = vpack.c.bf16 %v140_v28, %v139_v27  ;;  %v219_v30 = vld [vmem:[%s712_s5] sm:$0xff]  ;;  %v220_v31 = vld [vmem:[%s712_s5 + $0x8] sm:$0xff]  ;;  %v221_v32 = vld [vmem:[%s712_s5 + $0x10] sm:$0xff] }
  0x1a   :  { %434 = vmatprep.mubr.msk.f32.mxu0 %vm522_vm0, %v523_v1  ;;  %v465_v33 = vpack.c.bf16 %v220_v31, %v219_v30  ;;  %v222_v34 = vld [vmem:[%s712_s5 + $0x18] sm:$0xff]  ;;  %v223_v36 = vld [vmem:[%s712_s5 + $0x20] sm:$0xff]  ;;  %v224_v37 = vld [vmem:[%s712_s5 + $0x28] sm:$0xff] }
  0x1b   :  { %445 = vmatpush3.bf16.msra.mxu1 %v444_v11  ;;  %v468_v35 = vpack.c.bf16 %v222_v34, %v221_v32  ;;  %v471_v38 = vpack.c.bf16 %v224_v37, %v223_v36  ;;  %v225_v39 = vld [vmem:[%s712_s5 + $0x30] sm:$0xff]  ;;  %v226_v40 = vld [vmem:[%s712_s5 + $0x38] sm:$0xff]  ;;  %v227_v42 = vld [vmem:[%s712_s5 + $0x40] sm:$0xff] }
  0x1c   :  { %446 = vmatprep.subr.bf16.mxu1 %v521_v0  ;;  %466 = vmatpush3.bf16.msra.mxu0 %v465_v33  ;;  %v474_v41 = vpack.c.bf16 %v226_v40, %v225_v39  ;;  %v228_v43 = vld [vmem:[%s712_s5 + $0x48] sm:$0xff]  ;;  %v229_v45 = vld [vmem:[%s712_s5 + $0x50] sm:$0xff]  ;;  %v230_v46 = vld [vmem:[%s712_s5 + $0x58] sm:$0xff] }
  0x1d   :  { %467 = vmatprep.subr.bf16.mxu0 %v521_v0  ;;  %v477_v44 = vpack.c.bf16 %v228_v43, %v227_v42  ;;  %v480_v47 = vpack.c.bf16 %v230_v46, %v229_v45  ;;  %v231_v48 = vld [vmem:[%s712_s5 + $0x60] sm:$0xff]  ;;  %v232_v49 = vld [vmem:[%s712_s5 + $0x68] sm:$0xff]  ;;  %v233_v56 = vld [vmem:[%s712_s5 + $0x70] sm:$0xff] }
  0x1e   :  { %v483_v50 = vpack.c.bf16 %v232_v49, %v231_v48  ;;  %v319_v51 = vld [vmem:[%s709_s2] ss:$0 sm:$0xff]  ;;  %v234_v57 = vld [vmem:[%s712_s5 + $0x78] sm:$0xff] }
  0x1f   :  { %448 = vmatpush3.bf16.msra.mxu1 %v447_v14  ;;  %v486_v58 = vpack.c.bf16 %v234_v57, %v233_v56  ;;  %v321_v59 = vld [vmem:[%s711_s4] ss:$0 sm:$0xff] }
  0x20   :  { %449 = vmatprep.subr.bf16.mxu1 %v521_v0  ;;  %469 = vmatpush3.bf16.msra.mxu0 %v468_v35 }
  0x21   :  { %470 = vmatprep.subr.bf16.mxu0 %v521_v0 }
  0x23   :  { %451 = vmatpush3.bf16.msra.mxu1 %v450_v17 }
  0x24   :  { %452 = vmatprep.subr.bf16.mxu1 %v521_v0  ;;  %472 = vmatpush3.bf16.msra.mxu0 %v471_v38 }
  0x25   :  { %473 = vmatprep.subr.bf16.mxu0 %v521_v0 }
  0x27   :  { %454 = vmatpush3.bf16.msra.mxu1 %v453_v20 }
  0x28   :  { %455 = vmatprep.subr.bf16.mxu1 %v521_v0  ;;  %475 = vmatpush3.bf16.msra.mxu0 %v474_v41 }
  0x29   :  { %476 = vmatprep.subr.bf16.mxu0 %v521_v0 }
  0x2b   :  { %457 = vmatpush3.bf16.msra.mxu1 %v456_v23 }
  0x2c   :  { %458 = vmatprep.subr.bf16.mxu1 %v521_v0  ;;  %478 = vmatpush3.bf16.msra.mxu0 %v477_v44 }
  0x2d   :  { %479 = vmatprep.subr.bf16.mxu0 %v521_v0 }
  0x2f   :  { %460 = vmatpush3.bf16.msra.mxu1 %v459_v26 }
  0x30   :  { %461 = vmatprep.subr.bf16.mxu1 %v521_v0  ;;  %481 = vmatpush3.bf16.msra.mxu0 %v480_v47 }
  0x31   :  { %482 = vmatprep.subr.bf16.mxu0 %v521_v0 }
  0x33   :  { %463 = vmatpush3.bf16.msra.mxu1 %v462_v29 }
  0x34   :  { %484 = vmatpush3.bf16.msra.mxu0 %v483_v50 }
  0x35   :  { %485 = vmatprep.subr.bf16.mxu0 %v521_v0  ;;  %v322_v0 = vld [vmem:[%s713_s6] ss:$0 sm:$0xff] }
  0x38   :  { %487 = vmatpush3.bf16.msra.mxu0 %v486_v58 }
  0xec   :  { %v120_v52 = vpop.f32.mrb[0].mxu0 }
  0xed   :  { %v121_v53 = vadd.f32 %v319_v51, %v120_v52  ;;  %v366_v54 = vpop.f32.mrb[1].mxu0 }
  0xef   :  { %v124_v55 = vmax.f32 %v121_v53, 0.0 }
  0xf1   :  { %400 = vmatmul.mubr.f32.vlgmr.msra.gmra.mrb[0].mxu1 %v124_v55 }
 0x1c4   :  { %v214_v60 = vpop.f32.mrb[0].mxu1 }
 0x1c5   :  { %v215_v61 = vadd.f32 %v321_v59, %v214_v60  ;;  %v401_v62 = vpop.f32.mrb[1].mxu1 }
 0x1c7   :  { %v218_v63 = vmax.f32 %v215_v61, 0.0 }
 0x1c9   :  { %435 = vmatmul.mubr.f32.vlgmr.msra.gmra.mrb[2].mxu0 %v218_v63 }
 0x29c   :  { %v308_v1 = vpop.f32.mrb[2].mxu0 }
 0x29d   :  { %v309_v2 = vadd.f32 %v322_v0, %v308_v1  ;;  %v436_v3 = vpop.f32.mrb[3].mxu0 }
 0x29f   :  { %313 = vst.msk [vmem:[%s714_s7] sm:$0xff] %vm312_vm2, %v309_v2 }
 0x2a0   :  { %318 = vsyncpa [#allocation3], 1 }

// kernel: tpu_custom_call.1
= control target key start
LH: loop header
LB: loop body
LE: loop exit
PB: predicated region body
PF: predicated region fallthrough
CT: control target
= control target key end

     0   :  { %12 = vsyncpa [#allocation3], 0  ;;  %s518_s24 = smov [#allocation2]   ;;  %s707_s0 = inlined_call_operand.vmem [shape: f32[8,16], index: 0, kind: input, shape index: {}]   ;;  %s708_s1 = inlined_call_operand.hbm [shape: f32[16,128], index: 1, kind: input, shape index: {}]   ;;  %s709_s2 = inlined_call_operand.vmem [shape: f32[1,128], index: 2, kind: input, shape index: {}]   ;;  %s710_s3 = inlined_call_operand.vmem [shape: f32[128,128], index: 3, kind: input, shape index: {}]   ;;  %s711_s4 = inlined_call_operand.vmem [shape: f32[1,128], index: 4, kind: input, shape index: {}]   ;;  %s712_s5 = inlined_call_operand.vmem [shape: f32[128,4], index: 5, kind: input, shape index: {}]   ;;  %s713_s6 = inlined_call_operand.vmem [shape: f32[1,4], index: 6, kind: input, shape index: {}]   ;;  %s714_s7 = inlined_call_operand.vmem [shape: f32[8,4], index: 7, kind: output, shape index: {}]  }
   0x1   :  { %s20_s25 = sshll.u32 %s518_s24, 4  ;;  %s494_s28 = scalar_lea.hbm %s708_s1, 256  ;;  %s21_s25 = int_to_ptr.vmem [resolvable:$true] %s20_s25 }
   0x2   :  { %p495_p0 = scmp.ne.s32.totalorder %s708_s1, %s494_s28  ;;  %p498_p1 = scmp.lt.u32.totalorder %s494_s28, %s708_s1 }
   0x4   :  { %p500_p2 = pnand %p498_p1, %p495_p0 }
   0x6   :  { %503 = shalt.err (!%p500_p2)
}
   0x7   :  { %s504_s10 = scalar_lea.vmem %s21_s25, 256  ;;  %p509_p4 = scmp.lt.s32.totalorder %s21_s25, %s21_s25 }
   0x8   :  { %p505_p3 = scmp.ne.s32.totalorder %s21_s25, %s504_s10  ;;  %p510_p5 = scmp.lt.s32.totalorder %s504_s10, %s504_s10 }
   0xa   :  { %p511_p6 = por %p510_p5, %p509_p4 }
   0xc   :  { %p512_p7 = pnand %p511_p6, %p505_p3 }
   0xe   :  { %515 = shalt.err (!%p512_p7)
}
   0xf   :  { %s519_s11 = smov 128   ;;  %s520_s12 = smov 8  }
  0x10   :  { %26 = dma.hbm_to_vmem [thread:$0]  %s708_s1, 256, %s21_s25, [#allocation3], %s519_s11, %s519_s11, %s520_s12  }
  0x11   :  { %516 = dma.done.wait [#allocation3], 256  }
  0x12   :  { %517 = vsyncadd [#allocation3], 4294967040  ;;  %v521_v0 = vmov 0.0|0.0   ;;  %vm522_vm0 = vmmov 0   ;;  %v523_v1 = vmov 0.0   ;;  %v41_v2 = vld [vmem:[#allocation2] sm:$0xff] }
  0x13   :  { %437 = vmatprep.subr.bf16.mxu0 %v521_v0  ;;  %364 = vmatprep.mubr.msk.f32.mxu0 %vm522_vm0, %v523_v1  ;;  %v42_v3 = vld [vmem:[#allocation2 + $0x8] sm:$0xff]  ;;  %v125_v5 = vld [vmem:[%s710_s3] sm:$0xff]  ;;  %v127_v7 = vld [vmem:[%s710_s3 + $0x10] sm:$0xff]  ;;  %vm50_vm1 = vcmask 130048   ;;  %vm312_vm2 = vcmask 31744  }
  0x14   :  { %440 = vmatprep.subr.bf16.mxu1 %v521_v0  ;;  %399 = vmatprep.mubr.msk.f32.mxu1 %vm522_vm0, %v523_v1  ;;  %v438_v4 = vpack.c.bf16 %v42_v3, %v41_v2  ;;  %v126_v6 = vld [vmem:[%s710_s3 + $0x8] sm:$0xff]  ;;  %v128_v9 = vld [vmem:[%s710_s3 + $0x18] sm:$0xff]  ;;  %v40_v10 = vld [vmem:[%s707_s0] sm:$0xff] }
  0x15   :  { %v441_v8 = vpack.c.bf16 %v126_v6, %v125_v5  ;;  %v444_v11 = vpack.c.bf16 %v128_v9, %v127_v7  ;;  %v129_v12 = vld [vmem:[%s710_s3 + $0x20] sm:$0xff]  ;;  %v130_v13 = vld [vmem:[%s710_s3 + $0x28] sm:$0xff]  ;;  %v131_v15 = vld [vmem:[%s710_s3 + $0x30] sm:$0xff] }
  0x16   :  { %439 = vmatpush3.bf16.msra.mxu0 %v438_v4  ;;  %v447_v14 = vpack.c.bf16 %v130_v13, %v129_v12  ;;  %v132_v16 = vld [vmem:[%s710_s3 + $0x38] sm:$0xff]  ;;  %v133_v18 = vld [vmem:[%s710_s3 + $0x40] sm:$0xff]  ;;  %v134_v19 = vld [vmem:[%s710_s3 + $0x48] sm:$0xff] }
  0x17   :  { %442 = vmatpush3.bf16.msra.mxu1 %v441_v8  ;;  %464 = vmatprep.subr.bf16.mxu0 %v521_v0  ;;  %v450_v17 = vpack.c.bf16 %v132_v16, %v131_v15  ;;  %v453_v20 = vpack.c.bf16 %v134_v19, %v133_v18  ;;  %v135_v21 = vld [vmem:[%s710_s3 + $0x50] sm:$0xff]  ;;  %v136_v22 = vld [vmem:[%s710_s3 + $0x58] sm:$0xff]  ;;  %v137_v24 = vld [vmem:[%s710_s3 + $0x60] sm:$0xff] }
  0x18   :  { %443 = vmatprep.subr.bf16.mxu1 %v521_v0  ;;  %v456_v23 = vpack.c.bf16 %v136_v22, %v135_v21  ;;  %v138_v25 = vld [vmem:[%s710_s3 + $0x68] sm:$0xff]  ;;  %v139_v27 = vld [vmem:[%s710_s3 + $0x70] sm:$0xff]  ;;  %v140_v28 = vld [vmem:[%s710_s3 + $0x78] sm:$0xff] }
  0x19   :  { %365 = vmatmul.mubr.msk.f32.vlgmr.msra.gmra.mrb[0].mxu0 %vm50_vm1, %v40_v10  ;;  %v459_v26 = vpack.c.bf16 %v138_v25, %v137_v24  ;;  %v462_v29 = vpack.c.bf16 %v140_v28, %v139_v27  ;;  %v219_v30 = vld [vmem:[%s712_s5] sm:$0xff]  ;;  %v220_v31 = vld [vmem:[%s712_s5 + $0x8] sm:$0xff]  ;;  %v221_v32 = vld [vmem:[%s712_s5 + $0x10] sm:$0xff] }
  0x1a   :  { %434 = vmatprep.mubr.msk.f32.mxu0 %vm522_vm0, %v523_v1  ;;  %v465_v33 = vpack.c.bf16 %v220_v31, %v219_v30  ;;  %v222_v34 = vld [vmem:[%s712_s5 + $0x18] sm:$0xff]  ;;  %v223_v36 = vld [vmem:[%s712_s5 + $0x20] sm:$0xff]  ;;  %v224_v37 = vld [vmem:[%s712_s5 + $0x28] sm:$0xff] }
  0x1b   :  { %445 = vmatpush3.bf16.msra.mxu1 %v444_v11  ;;  %v468_v35 = vpack.c.bf16 %v222_v34, %v221_v32  ;;  %v471_v38 = vpack.c.bf16 %v224_v37, %v223_v36  ;;  %v225_v39 = vld [vmem:[%s712_s5 + $0x30] sm:$0xff]  ;;  %v226_v40 = vld [vmem:[%s712_s5 + $0x38] sm:$0xff]  ;;  %v227_v42 = vld [vmem:[%s712_s5 + $0x40] sm:$0xff] }
  0x1c   :  { %446 = vmatprep.subr.bf16.mxu1 %v521_v0  ;;  %466 = vmatpush3.bf16.msra.mxu0 %v465_v33  ;;  %v474_v41 = vpack.c.bf16 %v226_v40, %v225_v39  ;;  %v228_v43 = vld [vmem:[%s712_s5 + $0x48] sm:$0xff]  ;;  %v229_v45 = vld [vmem:[%s712_s5 + $0x50] sm:$0xff]  ;;  %v230_v46 = vld [vmem:[%s712_s5 + $0x58] sm:$0xff] }
  0x1d   :  { %467 = vmatprep.subr.bf16.mxu0 %v521_v0  ;;  %v477_v44 = vpack.c.bf16 %v228_v43, %v227_v42  ;;  %v480_v47 = vpack.c.bf16 %v230_v46, %v229_v45  ;;  %v231_v48 = vld [vmem:[%s712_s5 + $0x60] sm:$0xff]  ;;  %v232_v49 = vld [vmem:[%s712_s5 + $0x68] sm:$0xff]  ;;  %v233_v56 = vld [vmem:[%s712_s5 + $0x70] sm:$0xff] }
  0x1e   :  { %v483_v50 = vpack.c.bf16 %v232_v49, %v231_v48  ;;  %v319_v51 = vld [vmem:[%s709_s2] ss:$0 sm:$0xff]  ;;  %v234_v57 = vld [vmem:[%s712_s5 + $0x78] sm:$0xff] }
  0x1f   :  { %448 = vmatpush3.bf16.msra.mxu1 %v447_v14  ;;  %v486_v58 = vpack.c.bf16 %v234_v57, %v233_v56  ;;  %v321_v59 = vld [vmem:[%s711_s4] ss:$0 sm:$0xff] }
  0x20   :  { %449 = vmatprep.subr.bf16.mxu1 %v521_v0  ;;  %469 = vmatpush3.bf16.msra.mxu0 %v468_v35 }
  0x21   :  { %470 = vmatprep.subr.bf16.mxu0 %v521_v0 }
  0x23   :  { %451 = vmatpush3.bf16.msra.mxu1 %v450_v17 }
  0x24   :  { %452 = vmatprep.subr.bf16.mxu1 %v521_v0  ;;  %472 = vmatpush3.bf16.msra.mxu0 %v471_v38 }
  0x25   :  { %473 = vmatprep.subr.bf16.mxu0 %v521_v0 }
  0x27   :  { %454 = vmatpush3.bf16.msra.mxu1 %v453_v20 }
  0x28   :  { %455 = vmatprep.subr.bf16.mxu1 %v521_v0  ;;  %475 = vmatpush3.bf16.msra.mxu0 %v474_v41 }
  0x29   :  { %476 = vmatprep.subr.bf16.mxu0 %v521_v0 }
  0x2b   :  { %457 = vmatpush3.bf16.msra.mxu1 %v456_v23 }
  0x2c   :  { %458 = vmatprep.subr.bf16.mxu1 %v521_v0  ;;  %478 = vmatpush3.bf16.msra.mxu0 %v477_v44 }
  0x2d   :  { %479 = vmatprep.subr.bf16.mxu0 %v521_v0 }
  0x2f   :  { %460 = vmatpush3.bf16.msra.mxu1 %v459_v26 }
  0x30   :  { %461 = vmatprep.subr.bf16.mxu1 %v521_v0  ;;  %481 = vmatpush3.bf16.msra.mxu0 %v480_v47 }
  0x31   :  { %482 = vmatprep.subr.bf16.mxu0 %v521_v0 }
  0x33   :  { %463 = vmatpush3.bf16.msra.mxu1 %v462_v29 }
  0x34   :  { %484 = vmatpush3.bf16.msra.mxu0 %v483_v50 }
  0x35   :  { %485 = vmatprep.subr.bf16.mxu0 %v521_v0  ;;  %v322_v0 = vld [vmem:[%s713_s6] ss:$0 sm:$0xff] }
  0x38   :  { %487 = vmatpush3.bf16.msra.mxu0 %v486_v58 }
  0xec   :  { %v120_v52 = vpop.f32.mrb[0].mxu0 }
  0xed   :  { %v121_v53 = vadd.f32 %v319_v51, %v120_v52  ;;  %v366_v54 = vpop.f32.mrb[1].mxu0 }
  0xef   :  { %v124_v55 = vmax.f32 %v121_v53, 0.0 }
  0xf1   :  { %400 = vmatmul.mubr.f32.vlgmr.msra.gmra.mrb[0].mxu1 %v124_v55 }
 0x1c4   :  { %v214_v60 = vpop.f32.mrb[0].mxu1 }
 0x1c5   :  { %v215_v61 = vadd.f32 %v321_v59, %v214_v60  ;;  %v401_v62 = vpop.f32.mrb[1].mxu1 }
 0x1c7   :  { %v218_v63 = vmax.f32 %v215_v61, 0.0 }
 0x1c9   :  { %435 = vmatmul.mubr.f32.vlgmr.msra.gmra.mrb[2].mxu0 %v218_v63 }
 0x29c   :  { %v308_v1 = vpop.f32.mrb[2].mxu0 }
 0x29d   :  { %v309_v2 = vadd.f32 %v322_v0, %v308_v1  ;;  %v436_v3 = vpop.f32.mrb[3].mxu0 }
 0x29f   :  { %313 = vst.msk [vmem:[%s714_s7] sm:$0xff] %vm312_vm2, %v309_v2 }
 0x2a0   :  { %318 = vsyncpa [#allocation3], 1 }

</bundles_post_ra>
